<compile_context>
chip_gen: v7x
topology: tpu7x:2x2x1
jax: 0.10.0
libtpu: 0.0.40
codegen_flags: <defaults>
</compile_context>

<pallas_src>
import functools

import jax
import jax.numpy as jnp
from jax.experimental import pallas as pl
from jax.experimental.pallas import tpu as pltpu

EPS = 1e-5
LANE = 128                        # pad K / Cout to multiples of this (lane-dense)
VMEM_LIMIT = 32 * 1024 * 1024     # comfortably inside v5e/v6e/v7x scoped VMEM


# ----------------------------- Pallas kernels ------------------------------ #

def _matmul_stats_kernel(p_ref, w_ref, y_ref, st_ref):
    """y_tile = patches_tile(bf16) @ w(bf16) accumulated in f32; store y as
    bf16 and emit per-tile f32 channel (sum, sum-of-squares) partials so global
    BN stats can be reduced outside."""
    y = jnp.dot(p_ref[...], w_ref[...], preferred_element_type=jnp.float32)
    y_ref[...] = y.astype(y_ref.dtype)
    ssum = jnp.sum(y, axis=0, keepdims=True)          # (1, C)
    ssq = jnp.sum(y * y, axis=0, keepdims=True)       # (1, C)
    st_ref[...] = jnp.concatenate([ssum, ssq], axis=0).reshape(st_ref.shape)


def _scale_relu_kernel(y_ref, s_ref, t_ref, o_ref):
    """out = relu(y * s + t)  — BN folded into a single FMA (f32 math)."""
    v = y_ref[...] * s_ref[...] + t_ref[...]
    o_ref[...] = jnp.maximum(v, 0.0).astype(o_ref.dtype)


def _residual_relu_kernel(y_ref, s_ref, t_ref, r_ref, sr_ref, tr_ref, o_ref):
    """out = relu((y*s + t) + (r*sr + tr)); identity skip uses sr=1, tr=0."""
    main = y_ref[...] * s_ref[...] + t_ref[...]
    res = r_ref[...].astype(jnp.float32) * sr_ref[...] + tr_ref[...]
    o_ref[...] = jnp.maximum(main + res, 0.0).astype(o_ref.dtype)


# --------------------------- pallas_call wrappers --------------------------- #

def _compiler_params():
    return pltpu.CompilerParams(dimension_semantics=("parallel",),
                                vmem_limit_bytes=VMEM_LIMIT)


def _matmul_stats(patches, w, tm):
    mp, kp = patches.shape
    cols = w.shape[1]
    nt = mp // tm
    cost = pl.CostEstimate(
        flops=2 * mp * kp * cols,
        transcendentals=0,
        bytes_accessed=(patches.size * patches.dtype.itemsize
                        + w.size * w.dtype.itemsize
                        + mp * cols * 2 + nt * 2 * cols * 4))
    return pl.pallas_call(
        _matmul_stats_kernel,
        grid=(nt,),
        in_specs=[pl.BlockSpec((tm, kp), lambda i: (i, 0)),
                  pl.BlockSpec((kp, cols), lambda i: (0, 0))],   # VMEM-resident
        out_specs=(pl.BlockSpec((tm, cols), lambda i: (i, 0)),
                   pl.BlockSpec((1, 2, cols), lambda i: (i, 0, 0))),
        out_shape=(jax.ShapeDtypeStruct((mp, cols), jnp.bfloat16),
                   jax.ShapeDtypeStruct((nt, 2, cols), jnp.float32)),
        compiler_params=_compiler_params(),
        cost_estimate=cost,
    )(patches, w)


def _scale_relu(y, s, t, tm, col_block, out_dtype):
    mp = y.shape[0]
    cp = s.shape[1]
    return pl.pallas_call(
        _scale_relu_kernel,
        grid=(mp // tm,),
        in_specs=[pl.BlockSpec((tm, cp), lambda i: (i, col_block)),
                  pl.BlockSpec((1, cp), lambda i: (0, 0)),
                  pl.BlockSpec((1, cp), lambda i: (0, 0))],
        out_specs=pl.BlockSpec((tm, cp), lambda i: (i, 0)),
        out_shape=jax.ShapeDtypeStruct((mp, cp), out_dtype),
        compiler_params=_compiler_params(),
    )(y, s, t)


def _residual_relu(y, s, t, res, sr, tr, tm, res_col):
    mp = y.shape[0]
    cp = s.shape[1]
    return pl.pallas_call(
        _residual_relu_kernel,
        grid=(mp // tm,),
        in_specs=[pl.BlockSpec((tm, cp), lambda i: (i, 0)),
                  pl.BlockSpec((1, cp), lambda i: (0, 0)),
                  pl.BlockSpec((1, cp), lambda i: (0, 0)),
                  pl.BlockSpec((tm, cp), lambda i: (i, res_col)),
                  pl.BlockSpec((1, cp), lambda i: (0, 0)),
                  pl.BlockSpec((1, cp), lambda i: (0, 0))],
        out_specs=pl.BlockSpec((tm, cp), lambda i: (i, 0)),
        out_shape=jax.ShapeDtypeStruct((mp, cp), jnp.float32),
        compiler_params=_compiler_params(),
    )(y, s, t, res, sr, tr)


# ------------------------------- JAX glue ---------------------------------- #

def _round_up(x, m):
    return (x + m - 1) // m * m


def _pad1(v, n):
    return jnp.pad(v.astype(jnp.float32), (0, n - v.shape[0]))


def _pad2d(a, rows, cols):
    return jnp.pad(a, ((0, rows - a.shape[0]), (0, cols - a.shape[1])))


def _im2col(x_nhwc, ksize, stride, pad):
    """NHWC -> (N*Ho*Wo, ksize*ksize*C); K index order = (dy, dx, c)."""
    x = jnp.pad(x_nhwc, ((0, 0), (pad, pad), (pad, pad), (0, 0)))
    n, hp, wp, c = x.shape
    ho = (hp - ksize) // stride + 1
    wo = (wp - ksize) // stride + 1
    cols = []
    for dy in range(ksize):
        for dx in range(ksize):
            cols.append(x[:, dy:dy + (ho - 1) * stride + 1:stride,
                          dx:dx + (wo - 1) * stride + 1:stride, :])
    return jnp.concatenate(cols, axis=-1).reshape(n * ho * wo, ksize * ksize * c)


def _w_oihw_to_2d(w):
    o, i, kh, kw = w.shape
    return jnp.transpose(w, (2, 3, 1, 0)).reshape(kh * kw * i, o).astype(jnp.float32)


def _pad_weight(w2d, k_pad, c_pad, row_offset=0):
    k, c = w2d.shape
    return jnp.zeros((k_pad, c_pad), jnp.float32).at[
        row_offset:row_offset + k, :c].set(w2d)


def _finalize_stats(st, m_true):
    """(n_tiles, 2, C) partial sums -> per-channel mean and rsqrt(var + eps).
    Zero-padded M rows contribute 0 to both partials, so dividing by the true
    row count gives exact (biased) stats."""
    tot = jnp.sum(st, axis=0)                              # (2, C)
    mean = tot[0] / m_true
    var = jnp.maximum(tot[1] / m_true - mean * mean, 0.0)
    return mean, jax.lax.rsqrt(var + EPS)


def res_block_forward(x_nchw, params, stride, tm=None):
    cout, cin = params["w1"].shape[0], params["w1"].shape[1]
    has_skip = (stride != 1) or (cin != cout)

    x = jnp.transpose(x_nchw.astype(jnp.float32), (0, 2, 3, 1))   # -> NHWC
    n, h, w, _ = x.shape
    ho = (h - 1) // stride + 1
    wo = (w - 1) // stride + 1
    m = n * ho * wo
    cp = _round_up(cout, LANE)

    # Tile size along M: default sized so double-buffered bf16 patches + output
    # tiles stay a few MiB (well under v7x's 64 MiB VMEM); padded to the bf16
    # sublane granule (16).  Re-derive / shrink if K grows.
    if tm is None:
        tm = min(512, _round_up(m, 16))
    tm = max(16, _round_up(tm, 16))
    mp = _round_up(m, tm)

    # TODO(synk): the 3x3 patch extraction is still XLA-side im2col (an HBM
    # materialization); fully fusing it needs halo-DMA row bands inside the
    # matmul kernel (manual make_async_copy), left out here for robustness.

    # ---- pass A: conv1 matmul (+ fused 1x1-skip output columns) + stats ----
    p1 = _im2col(x.astype(jnp.bfloat16), 3, stride, 1)            # (m, 9*cin)
    k1p = _round_up(p1.shape[1], LANE)
    p1 = _pad2d(p1, mp, k1p)                                      # zero rows/cols
    w1p = _pad_weight(_w_oihw_to_2d(params["w1"]), k1p, cp)
    if has_skip:
        # 1x1/stride-s skip conv reads exactly the centre tap (dy=1, dx=1) of
        # the 3x3 patches -> fuse it as extra output columns of the same matmul.
        wsp = _pad_weight(_w_oihw_to_2d(params["ws"]), k1p, cp, row_offset=4 * cin)
        w_ext = jnp.concatenate([w1p, wsp], axis=1)               # (k1p, 2*cp)
    else:
        w_ext = w1p
    y1, st1 = _matmul_stats(p1, w_ext.astype(jnp.bfloat16), tm)

    mean1, inv1 = _finalize_stats(st1, m)
    s1 = _pad1(params["g1"], cp) * inv1[:cp]
    t1 = _pad1(params["be1"], cp) - mean1[:cp] * s1

    # ---- pass B: BN1 fused scale/shift + ReLU (bf16, feeds conv2 matmul) ----
    h1 = _scale_relu(y1, s1[None, :], t1[None, :], tm,
                     col_block=0, out_dtype=jnp.bfloat16)

    # Residual source and its fused BN scale/shift (identity -> sr=1, tr=0).
    if has_skip:
        sr = _pad1(params["gs"], cp) * inv1[cp:]
        tr = _pad1(params["bes"], cp) - mean1[cp:] * sr
        res_arr, res_col = y1, 1          # skip columns of the fused pass-A out
    else:
        sr = jnp.ones((cp,), jnp.float32)
        tr = jnp.zeros((cp,), jnp.float32)
        res_arr = _pad2d(x.reshape(m, cin), mp, cp)   # f32 identity, exact
        res_col = 0

    # ---- pass C: conv2 matmul + stats ----
    h1_nhwc = h1[:m, :cout].reshape(n, ho, wo, cout)
    p2 = _im2col(h1_nhwc, 3, 1, 1)                                # (m, 9*cout)
    k2p = _round_up(p2.shape[1], LANE)
    p2 = _pad2d(p2, mp, k2p)
    w2p = _pad_weight(_w_oihw_to_2d(params["w2"]), k2p, cp)
    y2, st2 = _matmul_stats(p2, w2p.astype(jnp.bfloat16), tm)

    mean2, inv2 = _finalize_stats(st2, m)
    s2 = _pad1(params["g2"], cp) * inv2
    t2 = _pad1(params["be2"], cp) - mean2 * s2

    # ---- pass D: BN2 + residual-BN + add + ReLU ----
    out_p = _residual_relu(y2, s2[None, :], t2[None, :],
                           res_arr, sr[None, :], tr[None, :], tm, res_col)
    out = out_p[:m, :cout].reshape(n, ho, wo, cout)
    return jnp.transpose(out, (0, 3, 1, 2))                        # -> NCHW


# --------------------------- pure-JAX reference ----------------------------- #

def _ref_conv(x, w, b, stride, pad):
    y = jax.lax.conv_general_dilated(
        x, w, (stride, stride), [(pad, pad), (pad, pad)],
        dimension_numbers=("NCHW", "OIHW", "NCHW"))
    return y + b[None, :, None, None]


def _ref_bn(x, g, b):
    mean = x.mean(axis=(0, 2, 3), keepdims=True)
    var = ((x - mean) ** 2).mean(axis=(0, 2, 3), keepdims=True)
    return g[None, :, None, None] * (x - mean) * jax.lax.rsqrt(var + EPS) \
        + b[None, :, None, None]


def res_block_reference(x, params, stride):
    cout, cin = params["w1"].shape[0], params["w1"].shape[1]
    if stride != 1 or cin != cout:
        identity = _ref_bn(_ref_conv(x, params["ws"], params["bs"], stride, 0),
                           params["gs"], params["bes"])
    else:
        identity = x
    out = _ref_conv(x, params["w1"], params["b1"], stride, 1)
    out = jnp.maximum(_ref_bn(out, params["g1"], params["be1"]), 0.0)
    out = _ref_conv(out, params["w2"], params["b2"], 1, 1)
    out = _ref_bn(out, params["g2"], params["be2"]) + identity
    return jnp.maximum(out, 0.0)


# ----------------------------------- main ----------------------------------- #

def init_params(key, cin, cout):
    ks = jax.random.split(key, 12)
    n = lambda k, s, sc=0.1: sc * jax.random.normal(k, s, jnp.float32)
    return {
        "w1": n(ks[0], (cout, cin, 3, 3)), "b1": n(ks[1], (cout,)),
        "g1": 1.0 + n(ks[2], (cout,)), "be1": n(ks[3], (cout,)),
        "w2": n(ks[4], (cout, cout, 3, 3)), "b2": n(ks[5], (cout,)),
        "g2": 1.0 + n(ks[6], (cout,)), "be2": n(ks[7], (cout,)),
        "ws": n(ks[8], (cout, cin, 1, 1)), "bs": n(ks[9], (cout,)),
        "gs": 1.0 + n(ks[10], (cout,)), "bes": n(ks[11], (cout,)),
    }


if __name__ == "__main__":
    key = jax.random.PRNGKey(0)
    k_x, k_p = jax.random.split(key)

    # Primary config: downsampling block with 1x1-conv + BN projection skip.
    N, C_IN, C_OUT, H, W, STRIDE = 2, 4, 8, 16, 16, 2
    x = jax.random.normal(k_x, (N, C_IN, H, W), jnp.float32)
    params = init_params(k_p, C_IN, C_OUT)

    fwd = jax.jit(functools.partial(res_block_forward, stride=STRIDE, tm=64))
    out = jax.block_until_ready(fwd(x, params))
    ref = res_block_reference(x, params, STRIDE)
    assert out.shape == ref.shape == (N, C_OUT, H // STRIDE, W // STRIDE)
    err = jnp.max(jnp.abs(out - ref))
    assert jnp.allclose(out, ref, atol=5e-2, rtol=5e-2), f"max abs diff {err}"

    # Secondary config: identity skip (stride=1, cin == cout) path.
    k_x2, k_p2 = jax.random.split(jax.random.PRNGKey(1))
    x2 = jax.random.normal(k_x2, (2, 8, 16, 16), jnp.float32)
    params2 = init_params(k_p2, 8, 8)
    fwd2 = jax.jit(functools.partial(res_block_forward, stride=1, tm=128))
    out2 = jax.block_until_ready(fwd2(x2, params2))
    ref2 = res_block_reference(x2, params2, 1)
    assert out2.shape == ref2.shape == (2, 8, 16, 16)
    err2 = jnp.max(jnp.abs(out2 - ref2))
    assert jnp.allclose(out2, ref2, atol=5e-2, rtol=5e-2), f"max abs diff {err2}"

    print("KERNEL_OK")
</pallas_src>

<mosaic_0001>
module attributes {stable_mosaic.version = 11 : i64} {
  func.func @_matmul_stats_kernel(%arg0: i32, %arg1: memref<64x128xbf16, #tpu.memory_space<vmem>>, %arg2: memref<128x256xbf16, #tpu.memory_space<vmem>>, %arg3: memref<64x256xbf16, #tpu.memory_space<vmem>>, %arg4: memref<1x2x256xf32, #tpu.memory_space<vmem>>) attributes {dimension_semantics = [#tpu.dimension_semantics<parallel>], iteration_bounds = array<i64: 2>, scalar_prefetch = 0 : i64, scratch_operands = 0 : i64, tpu.core_type = #tpu.core_type<tc>, window_params = [{transform_indices = @transform_0, window_bounds = array<i64: 64, 128>}, {pipeline_mode = #tpu.pipeline_mode<synchronous>, transform_indices = @transform_1, window_bounds = array<i64: 128, 256>}, {transform_indices = @transform_2, window_bounds = array<i64: 64, 256>}, {transform_indices = @transform_3, window_bounds = array<i64: 1, 2, 256>}]} {
    %c0 = arith.constant 0 : index
    %c0_0 = arith.constant 0 : index
    %0 = vector.load %arg1[%c0, %c0_0] : memref<64x128xbf16, #tpu.memory_space<vmem>>, vector<64x128xbf16>
    %c0_1 = arith.constant 0 : index
    %c0_2 = arith.constant 0 : index
    %1 = vector.load %arg2[%c0_1, %c0_2] : memref<128x256xbf16, #tpu.memory_space<vmem>>, vector<128x256xbf16>
    %cst = arith.constant dense<0.000000e+00> : vector<64x256xf32>
    %2 = tpu.matmul %0, %1, %cst {dimension_numbers = #tpu.dot_dimension_numbers<[1], [0], [0], [1], [0, 0, 1, 1], [], []>} : vector<64x128xbf16>, vector<128x256xbf16>, vector<64x256xf32> -> vector<64x256xf32>
    %3 = arith.truncf %2 : vector<64x256xf32> to vector<64x256xbf16>
    %c0_3 = arith.constant 0 : index
    %c0_4 = arith.constant 0 : index
    %4 = vector.load %arg3[%c0_3, %c0_4] : memref<64x256xbf16, #tpu.memory_space<vmem>>, vector<64x256xbf16>
    tpu.vector_store %arg3[%c0_3, %c0_4], %3 {strides = array<i32>} : memref<64x256xbf16, #tpu.memory_space<vmem>>, vector<64x256xbf16>,
    %cst_5 = arith.constant dense<0.000000e+00> : vector<256xf32>
    %5 = vector.multi_reduction <add>, %2, %cst_5 [0] : vector<64x256xf32> to vector<256xf32>
    %6 = vector.shape_cast %5 : vector<256xf32> to vector<1x256xf32>
    %7 = arith.mulf %2, %2 : vector<64x256xf32>
    %cst_6 = arith.constant dense<0.000000e+00> : vector<256xf32>
    %8 = vector.multi_reduction <add>, %7, %cst_6 [0] : vector<64x256xf32> to vector<256xf32>
    %9 = vector.shape_cast %8 : vector<256xf32> to vector<1x256xf32>
    %10 = tpu.concatenate %6, %9 in 0 : vector<1x256xf32>, vector<1x256xf32> -> vector<2x256xf32>
    %11 = vector.shape_cast %10 : vector<2x256xf32> to vector<1x2x256xf32>
    %c0_7 = arith.constant 0 : index
    %c0_8 = arith.constant 0 : index
    %c0_9 = arith.constant 0 : index
    %12 = vector.load %arg4[%c0_7, %c0_8, %c0_9] : memref<1x2x256xf32, #tpu.memory_space<vmem>>, vector<1x2x256xf32>
    tpu.vector_store %arg4[%c0_7, %c0_8, %c0_9], %11 {strides = array<i32>} : memref<1x2x256xf32, #tpu.memory_space<vmem>>, vector<1x2x256xf32>,
    return
  }
  func.func @transform_0(%arg0: i32) -> (i32, i32) {
    %c0_i32 = arith.constant 0 : i32
    %c0_i32_0 = arith.constant 0 : i32
    return %arg0, %c0_i32 : i32, i32
  }
  func.func @transform_1(%arg0: i32) -> (i32, i32) {
    %c0_i32 = arith.constant 0 : i32
    %c0_i32_0 = arith.constant 0 : i32
    %c0_i32_1 = arith.constant 0 : i32
    return %c0_i32, %c0_i32_0 : i32, i32
  }
  func.func @transform_2(%arg0: i32) -> (i32, i32) {
    %c0_i32 = arith.constant 0 : i32
    %c0_i32_0 = arith.constant 0 : i32
    return %arg0, %c0_i32 : i32, i32
  }
  func.func @transform_3(%arg0: i32) -> (i32, i32, i32) {
    %c0_i32 = arith.constant 0 : i32
    %c0_i32_0 = arith.constant 0 : i32
    %c0_i32_1 = arith.constant 0 : i32
    return %arg0, %c0_i32, %c0_i32_0 : i32, i32, i32
  }
}

module attributes {stable_mosaic.version = 11 : i64} {
  func.func @_scale_relu_kernel(%arg0: i32, %arg1: memref<64x128xbf16, #tpu.memory_space<vmem>>, %arg2: memref<1x128xf32, #tpu.memory_space<vmem>>, %arg3: memref<1x128xf32, #tpu.memory_space<vmem>>, %arg4: memref<64x128xbf16, #tpu.memory_space<vmem>>) attributes {dimension_semantics = [#tpu.dimension_semantics<parallel>], iteration_bounds = array<i64: 2>, scalar_prefetch = 0 : i64, scratch_operands = 0 : i64, tpu.core_type = #tpu.core_type<tc>, window_params = [{transform_indices = @transform_0, window_bounds = array<i64: 64, 128>}, {pipeline_mode = #tpu.pipeline_mode<synchronous>, transform_indices = @transform_1, window_bounds = array<i64: 1, 128>}, {pipeline_mode = #tpu.pipeline_mode<synchronous>, transform_indices = @transform_2, window_bounds = array<i64: 1, 128>}, {transform_indices = @transform_3, window_bounds = array<i64: 64, 128>}]} {
    %c0 = arith.constant 0 : index
    %c0_0 = arith.constant 0 : index
    %0 = vector.load %arg1[%c0, %c0_0] : memref<64x128xbf16, #tpu.memory_space<vmem>>, vector<64x128xbf16>
    %c0_1 = arith.constant 0 : index
    %c0_2 = arith.constant 0 : index
    %1 = vector.load %arg2[%c0_1, %c0_2] : memref<1x128xf32, #tpu.memory_space<vmem>>, vector<1x128xf32>
    %2 = arith.extf %0 : vector<64x128xbf16> to vector<64x128xf32>
    %3 = vector.broadcast %1 : vector<1x128xf32> to vector<64x128xf32>
    %4 = arith.mulf %2, %3 : vector<64x128xf32>
    %c0_3 = arith.constant 0 : index
    %c0_4 = arith.constant 0 : index
    %5 = vector.load %arg3[%c0_3, %c0_4] : memref<1x128xf32, #tpu.memory_space<vmem>>, vector<1x128xf32>
    %6 = vector.broadcast %5 : vector<1x128xf32> to vector<64x128xf32>
    %7 = arith.addf %4, %6 : vector<64x128xf32>
    %cst = arith.constant 0.000000e+00 : f32
    %8 = vector.broadcast %cst : f32 to vector<64x128xf32>
    %9 = arith.maximumf %7, %8 : vector<64x128xf32>
    %10 = arith.truncf %9 : vector<64x128xf32> to vector<64x128xbf16>
    %c0_5 = arith.constant 0 : index
    %c0_6 = arith.constant 0 : index
    %11 = vector.load %arg4[%c0_5, %c0_6] : memref<64x128xbf16, #tpu.memory_space<vmem>>, vector<64x128xbf16>
    tpu.vector_store %arg4[%c0_5, %c0_6], %10 {strides = array<i32>} : memref<64x128xbf16, #tpu.memory_space<vmem>>, vector<64x128xbf16>,
    return
  }
  func.func @transform_0(%arg0: i32) -> (i32, i32) {
    %c0_i32 = arith.constant 0 : i32
    %c0_i32_0 = arith.constant 0 : i32
    return %arg0, %c0_i32 : i32, i32
  }
  func.func @transform_1(%arg0: i32) -> (i32, i32) {
    %c0_i32 = arith.constant 0 : i32
    %c0_i32_0 = arith.constant 0 : i32
    %c0_i32_1 = arith.constant 0 : i32
    return %c0_i32, %c0_i32_0 : i32, i32
  }
  func.func @transform_2(%arg0: i32) -> (i32, i32) {
    %c0_i32 = arith.constant 0 : i32
    %c0_i32_0 = arith.constant 0 : i32
    %c0_i32_1 = arith.constant 0 : i32
    return %c0_i32, %c0_i32_0 : i32, i32
  }
  func.func @transform_3(%arg0: i32) -> (i32, i32) {
    %c0_i32 = arith.constant 0 : i32
    %c0_i32_0 = arith.constant 0 : i32
    return %arg0, %c0_i32 : i32, i32
  }
}

module attributes {stable_mosaic.version = 11 : i64} {
  func.func @_matmul_stats_kernel(%arg0: i32, %arg1: memref<64x128xbf16, #tpu.memory_space<vmem>>, %arg2: memref<128x128xbf16, #tpu.memory_space<vmem>>, %arg3: memref<64x128xbf16, #tpu.memory_space<vmem>>, %arg4: memref<1x2x128xf32, #tpu.memory_space<vmem>>) attributes {dimension_semantics = [#tpu.dimension_semantics<parallel>], iteration_bounds = array<i64: 2>, scalar_prefetch = 0 : i64, scratch_operands = 0 : i64, tpu.core_type = #tpu.core_type<tc>, window_params = [{transform_indices = @transform_0, window_bounds = array<i64: 64, 128>}, {pipeline_mode = #tpu.pipeline_mode<synchronous>, transform_indices = @transform_1, window_bounds = array<i64: 128, 128>}, {transform_indices = @transform_2, window_bounds = array<i64: 64, 128>}, {transform_indices = @transform_3, window_bounds = array<i64: 1, 2, 128>}]} {
    %c0 = arith.constant 0 : index
    %c0_0 = arith.constant 0 : index
    %0 = vector.load %arg1[%c0, %c0_0] : memref<64x128xbf16, #tpu.memory_space<vmem>>, vector<64x128xbf16>
    %c0_1 = arith.constant 0 : index
    %c0_2 = arith.constant 0 : index
    %1 = vector.load %arg2[%c0_1, %c0_2] : memref<128x128xbf16, #tpu.memory_space<vmem>>, vector<128x128xbf16>
    %cst = arith.constant dense<0.000000e+00> : vector<64x128xf32>
    %2 = tpu.matmul %0, %1, %cst {dimension_numbers = #tpu.dot_dimension_numbers<[1], [0], [0], [1], [0, 0, 1, 1], [], []>} : vector<64x128xbf16>, vector<128x128xbf16>, vector<64x128xf32> -> vector<64x128xf32>
    %3 = arith.truncf %2 : vector<64x128xf32> to vector<64x128xbf16>
    %c0_3 = arith.constant 0 : index
    %c0_4 = arith.constant 0 : index
    %4 = vector.load %arg3[%c0_3, %c0_4] : memref<64x128xbf16, #tpu.memory_space<vmem>>, vector<64x128xbf16>
    tpu.vector_store %arg3[%c0_3, %c0_4], %3 {strides = array<i32>} : memref<64x128xbf16, #tpu.memory_space<vmem>>, vector<64x128xbf16>,
    %cst_5 = arith.constant dense<0.000000e+00> : vector<128xf32>
    %5 = vector.multi_reduction <add>, %2, %cst_5 [0] : vector<64x128xf32> to vector<128xf32>
    %6 = vector.shape_cast %5 : vector<128xf32> to vector<1x128xf32>
    %7 = arith.mulf %2, %2 : vector<64x128xf32>
    %cst_6 = arith.constant dense<0.000000e+00> : vector<128xf32>
    %8 = vector.multi_reduction <add>, %7, %cst_6 [0] : vector<64x128xf32> to vector<128xf32>
    %9 = vector.shape_cast %8 : vector<128xf32> to vector<1x128xf32>
    %10 = tpu.concatenate %6, %9 in 0 : vector<1x128xf32>, vector<1x128xf32> -> vector<2x128xf32>
    %11 = vector.shape_cast %10 : vector<2x128xf32> to vector<1x2x128xf32>
    %c0_7 = arith.constant 0 : index
    %c0_8 = arith.constant 0 : index
    %c0_9 = arith.constant 0 : index
    %12 = vector.load %arg4[%c0_7, %c0_8, %c0_9] : memref<1x2x128xf32, #tpu.memory_space<vmem>>, vector<1x2x128xf32>
    tpu.vector_store %arg4[%c0_7, %c0_8, %c0_9], %11 {strides = array<i32>} : memref<1x2x128xf32, #tpu.memory_space<vmem>>, vector<1x2x128xf32>,
    return
  }
  func.func @transform_0(%arg0: i32) -> (i32, i32) {
    %c0_i32 = arith.constant 0 : i32
    %c0_i32_0 = arith.constant 0 : i32
    return %arg0, %c0_i32 : i32, i32
  }
  func.func @transform_1(%arg0: i32) -> (i32, i32) {
    %c0_i32 = arith.constant 0 : i32
    %c0_i32_0 = arith.constant 0 : i32
    %c0_i32_1 = arith.constant 0 : i32
    return %c0_i32, %c0_i32_0 : i32, i32
  }
  func.func @transform_2(%arg0: i32) -> (i32, i32) {
    %c0_i32 = arith.constant 0 : i32
    %c0_i32_0 = arith.constant 0 : i32
    return %arg0, %c0_i32 : i32, i32
  }
  func.func @transform_3(%arg0: i32) -> (i32, i32, i32) {
    %c0_i32 = arith.constant 0 : i32
    %c0_i32_0 = arith.constant 0 : i32
    %c0_i32_1 = arith.constant 0 : i32
    return %arg0, %c0_i32, %c0_i32_0 : i32, i32, i32
  }
}

module attributes {stable_mosaic.version = 11 : i64} {
  func.func @_residual_relu_kernel(%arg0: i32, %arg1: memref<64x128xbf16, #tpu.memory_space<vmem>>, %arg2: memref<1x128xf32, #tpu.memory_space<vmem>>, %arg3: memref<1x128xf32, #tpu.memory_space<vmem>>, %arg4: memref<64x128xbf16, #tpu.memory_space<vmem>>, %arg5: memref<1x128xf32, #tpu.memory_space<vmem>>, %arg6: memref<1x128xf32, #tpu.memory_space<vmem>>, %arg7: memref<64x128xf32, #tpu.memory_space<vmem>>) attributes {dimension_semantics = [#tpu.dimension_semantics<parallel>], iteration_bounds = array<i64: 2>, scalar_prefetch = 0 : i64, scratch_operands = 0 : i64, tpu.core_type = #tpu.core_type<tc>, window_params = [{transform_indices = @transform_0, window_bounds = array<i64: 64, 128>}, {pipeline_mode = #tpu.pipeline_mode<synchronous>, transform_indices = @transform_1, window_bounds = array<i64: 1, 128>}, {pipeline_mode = #tpu.pipeline_mode<synchronous>, transform_indices = @transform_2, window_bounds = array<i64: 1, 128>}, {transform_indices = @transform_3, window_bounds = array<i64: 64, 128>}, {pipeline_mode = #tpu.pipeline_mode<synchronous>, transform_indices = @transform_4, window_bounds = array<i64: 1, 128>}, {pipeline_mode = #tpu.pipeline_mode<synchronous>, transform_indices = @transform_5, window_bounds = array<i64: 1, 128>}, {transform_indices = @transform_6, window_bounds = array<i64: 64, 128>}]} {
    %c0 = arith.constant 0 : index
    %c0_0 = arith.constant 0 : index
    %0 = vector.load %arg1[%c0, %c0_0] : memref<64x128xbf16, #tpu.memory_space<vmem>>, vector<64x128xbf16>
    %c0_1 = arith.constant 0 : index
    %c0_2 = arith.constant 0 : index
    %1 = vector.load %arg2[%c0_1, %c0_2] : memref<1x128xf32, #tpu.memory_space<vmem>>, vector<1x128xf32>
    %2 = arith.extf %0 : vector<64x128xbf16> to vector<64x128xf32>
    %3 = vector.broadcast %1 : vector<1x128xf32> to vector<64x128xf32>
    %4 = arith.mulf %2, %3 : vector<64x128xf32>
    %c0_3 = arith.constant 0 : index
    %c0_4 = arith.constant 0 : index
    %5 = vector.load %arg3[%c0_3, %c0_4] : memref<1x128xf32, #tpu.memory_space<vmem>>, vector<1x128xf32>
    %6 = vector.broadcast %5 : vector<1x128xf32> to vector<64x128xf32>
    %7 = arith.addf %4, %6 : vector<64x128xf32>
    %c0_5 = arith.constant 0 : index
    %c0_6 = arith.constant 0 : index
    %8 = vector.load %arg4[%c0_5, %c0_6] : memref<64x128xbf16, #tpu.memory_space<vmem>>, vector<64x128xbf16>
    %9 = arith.extf %8 : vector<64x128xbf16> to vector<64x128xf32>
    %c0_7 = arith.constant 0 : index
    %c0_8 = arith.constant 0 : index
    %10 = vector.load %arg5[%c0_7, %c0_8] : memref<1x128xf32, #tpu.memory_space<vmem>>, vector<1x128xf32>
    %11 = vector.broadcast %10 : vector<1x128xf32> to vector<64x128xf32>
    %12 = arith.mulf %9, %11 : vector<64x128xf32>
    %c0_9 = arith.constant 0 : index
    %c0_10 = arith.constant 0 : index
    %13 = vector.load %arg6[%c0_9, %c0_10] : memref<1x128xf32, #tpu.memory_space<vmem>>, vector<1x128xf32>
    %14 = vector.broadcast %13 : vector<1x128xf32> to vector<64x128xf32>
    %15 = arith.addf %12, %14 : vector<64x128xf32>
    %16 = arith.addf %7, %15 : vector<64x128xf32>
    %cst = arith.constant 0.000000e+00 : f32
    %17 = vector.broadcast %cst : f32 to vector<64x128xf32>
    %18 = arith.maximumf %16, %17 : vector<64x128xf32>
    %c0_11 = arith.constant 0 : index
    %c0_12 = arith.constant 0 : index
    %19 = vector.load %arg7[%c0_11, %c0_12] : memref<64x128xf32, #tpu.memory_space<vmem>>, vector<64x128xf32>
    tpu.vector_store %arg7[%c0_11, %c0_12], %18 {strides = array<i32>} : memref<64x128xf32, #tpu.memory_space<vmem>>, vector<64x128xf32>,
    return
  }
  func.func @transform_0(%arg0: i32) -> (i32, i32) {
    %c0_i32 = arith.constant 0 : i32
    %c0_i32_0 = arith.constant 0 : i32
    return %arg0, %c0_i32 : i32, i32
  }
  func.func @transform_1(%arg0: i32) -> (i32, i32) {
    %c0_i32 = arith.constant 0 : i32
    %c0_i32_0 = arith.constant 0 : i32
    %c0_i32_1 = arith.constant 0 : i32
    return %c0_i32, %c0_i32_0 : i32, i32
  }
  func.func @transform_2(%arg0: i32) -> (i32, i32) {
    %c0_i32 = arith.constant 0 : i32
    %c0_i32_0 = arith.constant 0 : i32
    %c0_i32_1 = arith.constant 0 : i32
    return %c0_i32, %c0_i32_0 : i32, i32
  }
  func.func @transform_3(%arg0: i32) -> (i32, i32) {
    %c1_i32 = arith.constant 1 : i32
    %c0_i32 = arith.constant 0 : i32
    return %arg0, %c1_i32 : i32, i32
  }
  func.func @transform_4(%arg0: i32) -> (i32, i32) {
    %c0_i32 = arith.constant 0 : i32
    %c0_i32_0 = arith.constant 0 : i32
    %c0_i32_1 = arith.constant 0 : i32
    return %c0_i32, %c0_i32_0 : i32, i32
  }
  func.func @transform_5(%arg0: i32) -> (i32, i32) {
    %c0_i32 = arith.constant 0 : i32
    %c0_i32_0 = arith.constant 0 : i32
    %c0_i32_1 = arith.constant 0 : i32
    return %c0_i32, %c0_i32_0 : i32, i32
  }
  func.func @transform_6(%arg0: i32) -> (i32, i32) {
    %c0_i32 = arith.constant 0 : i32
    %c0_i32_0 = arith.constant 0 : i32
    return %arg0, %c0_i32 : i32, i32
  }
}

</mosaic_0001>

<bundles_post_ra>
// kernel: res_block_forward.5
= control target key start
LH: loop header
LB: loop body
LE: loop exit
PB: predicated region body
PF: predicated region fallthrough
CT: control target
= control target key end

     0   :  { %s544_s12 = smov 0   ;;  %s546_s13 = smov 0   ;;  %s605_s0 = inlined_call_operand.vmem [shape: bf16[128,256], index: 0, kind: input, shape index: {}]   ;;  %s606_s1 = inlined_call_operand.vmem [shape: f32[1,128], index: 1, kind: input, shape index: {}]   ;;  %s607_s2 = inlined_call_operand.vmem [shape: f32[1,128], index: 2, kind: input, shape index: {}]   ;;  %s608_s3 = inlined_call_operand.vmem [shape: bf16[128,128], index: 3, kind: output, shape index: {}]  }
   0x1   :  { %s548_s14 = smov 0  }
   0x2 LB: > { %s400_s15 = sadd.s32 4294967295, %s522_s14   ;;  %s561_s16 = sadd.s32 1, %s522_s14   ;;  %s522_s14 = sphi %s548_s14, %s611_s14   ;;  %s518_s13 = sphi %s546_s13, %s610_s13   ;;  %s514_s12 = sphi %s544_s12, %s609_s12  }
   0x3   : > { %s17_s17 = ssub.s32 %s522_s14, %s561_s16  ;;  %s20_s18 = sadd.s32 1, %s518_s13 }
   0x4   : > { %p18_p0 = scmp.eq.s32.totalorder %s17_s17, 0  ;;  %p27_p1 = scmp.ne.s32.totalorder %s518_s13, %s514_s12 }
   0x5   : > { %p28_p2 = scmp.eq.s32.totalorder %s522_s14, 0  ;;  %p403_p4 = scmp.ge.s32.totalorder %s522_s14, 2 }
   0x6   : > { %s570_s19 = scalar_select %p18_p0, %s518_s13, %s20_s18  }
   0x7   : > { %p29_p3 = por %p28_p2, %p27_p1  ;;  %127 = sbr.rel (%p403_p4) target bundleno = 23 (0x17), region = 24 }
   0xe   : > { %130 = sbr.rel (!%p29_p3) target bundleno = 23 (0x17), region = 28  ;;  %s132_s20 = sand.u32 (%p29_p3), 1, %s518_s13  }
   0xf   : > { %s425_s21 = sshll.u32 (%p29_p3), %s522_s14, 6  ;;  %s404_s22 = sshll.u32 (%p29_p3), %s132_s20, 5 }
  0x10   : > { %s138_s25 = scalar_lea.vmem (%p29_p3), %s605_s0, %s425_s21  ;;  %s134_s26 = scalar_lea.vmem (%p29_p3), [#allocation2], %s404_s22 }
  0x11   : > { %v154_v0 = vld [vmem:[%s138_s25] sm:$0xf] (%p29_p3)  ;;  %v156_v1 = vld [vmem:[%s138_s25 + $0x8] sm:$0xf] (%p29_p3)  ;;  %v158_v2 = vld [vmem:[%s138_s25 + $0x10] sm:$0xf] (%p29_p3) }
  0x12   : > { %155 = vst [vmem:[%s134_s26] sm:$0xf] (%p29_p3), %v154_v0  ;;  %157 = vst [vmem:[%s134_s26 + $0x4] sm:$0xf] (%p29_p3), %v156_v1  ;;  %v160_v3 = vld [vmem:[%s138_s25 + $0x18] sm:$0xf] (%p29_p3) }
  0x13   : > { %v162_v4 = vld [vmem:[%s138_s25 + $0x20] sm:$0xf] (%p29_p3)  ;;  %159 = vst [vmem:[%s134_s26 + $0x8] sm:$0xf] (%p29_p3), %v158_v2  ;;  %161 = vst [vmem:[%s134_s26 + $0xc] sm:$0xf] (%p29_p3), %v160_v3 }
  0x14   : > { %163 = vst [vmem:[%s134_s26 + $0x10] sm:$0xf] (%p29_p3), %v162_v4  ;;  %v164_v5 = vld [vmem:[%s138_s25 + $0x28] sm:$0xf] (%p29_p3)  ;;  %v166_v6 = vld [vmem:[%s138_s25 + $0x30] sm:$0xf] (%p29_p3) }
  0x15   : > { %v168_v7 = vld [vmem:[%s138_s25 + $0x38] sm:$0xf]  ;;  %165 = vst [vmem:[%s134_s26 + $0x14] sm:$0xf] %v164_v5  ;;  %167 = vst [vmem:[%s134_s26 + $0x18] sm:$0xf] %v166_v6 }
  0x16   : > { %169 = vst [vmem:[%s134_s26 + $0x1c] sm:$0xf] %v168_v7 }
  0x17 PF: > { %p408_p5 = scmp.ge.s32.totalorder %s522_s14, 1  ;;  %p207_p6 = scmp.lt.s32.totalorder %s522_s14, 3 }
  0x19   : > { %p208_p7 = pnand %p408_p5, %p207_p6 }
  0x1a   : > { %s214_s27 = sand.u32 (!%p208_p7), 1, %s514_s12   ;;  %s410_s28 = sshll.u32 (!%p208_p7), %s400_s15, 3  ;;  %v412_v8 = vld [vmem:[%s606_s1] ss:$0 sm:$0xff] (!%p208_p7) }
  0x1b   : > { %211 = sbr.rel (%p208_p7) target bundleno = 42 (0x2a), region = 69  ;;  %s409_s29 = sshll.u32 (!%p208_p7), %s214_s27, 5  ;;  %v413_v17 = vld [vmem:[%s607_s2] ss:$0 sm:$0xff] (!%p208_p7) }
  0x1c   : > { %p239_p8 = scmp.lt.s32.totalorder (!%p208_p7), %s410_s28, 15  ;;  %s216_s5 = scalar_lea.vmem (!%p208_p7), [#allocation2], %s409_s29 }
  0x1d   : > { %v435_v9 = vld [vmem:[%s216_s5] sm:$0xff] (!%p208_p7)   ;;  %v470_v10 = vld [vmem:[%s216_s5 + $0x8] sm:$0xff] (!%p208_p7)   ;;  %v471_v11 = vld [vmem:[%s216_s5 + $0x10] sm:$0xff] (!%p208_p7)  }
  0x1e   : > { %v436_v12 = vunpack.c.l.bf16 (!%p208_p7), %v435_v9  ;;  %v437_v13 = vunpack.c.h.bf16 (!%p208_p7), %v435_v9  ;;  %v440_v14 = vunpack.c.l.bf16 (!%p208_p7), %v470_v10  ;;  %v441_v15 = vunpack.c.h.bf16 (!%p208_p7), %v470_v10  ;;  %v472_v16 = vld [vmem:[%s216_s5 + $0x18] sm:$0xff] (!%p208_p7)  }
  0x1f   : > { %v444_v18 = vunpack.c.l.bf16 (!%p208_p7), %v471_v11  ;;  %v445_v19 = vunpack.c.h.bf16 (!%p208_p7), %v471_v11  ;;  %v448_v20 = vunpack.c.l.bf16 (!%p208_p7), %v472_v16  ;;  %v449_v21 = vunpack.c.h.bf16 (!%p208_p7), %v472_v16 }
  0x20   : > { %v267_v22 = vmul.f32 (!%p208_p7), %v436_v12, %v412_v8  ;;  %v268_v23 = vmul.f32 (!%p208_p7), %v437_v13, %v412_v8  ;;  %v269_v24 = vmul.f32 (!%p208_p7), %v440_v14, %v412_v8  ;;  %v270_v25 = vmul.f32 (!%p208_p7), %v441_v15, %v412_v8 }
  0x21   : > { %v271_v26 = vmul.f32 (!%p208_p7), %v444_v18, %v412_v8  ;;  %v272_v27 = vmul.f32 (!%p208_p7), %v445_v19, %v412_v8  ;;  %v273_v28 = vmul.f32 (!%p208_p7), %v448_v20, %v412_v8  ;;  %v274_v29 = vmul.f32 (!%p208_p7), %v449_v21, %v412_v8 }
  0x22   : > { %s613_s28 = smov (!%p239_p8, %s410_s28), 15  ;;  %v282_v30 = vadd.f32 %v413_v17, %v267_v22  ;;  %v283_v31 = vadd.f32 %v413_v17, %v268_v23  ;;  %v284_v32 = vadd.f32 %v413_v17, %v269_v24  ;;  %v285_v33 = vadd.f32 %v413_v17, %v270_v25 }
  0x23   : > { %s411_s8 = sshll.u32 %s613_s28, 2  ;;  %v286_v34 = vadd.f32 %v413_v17, %v271_v26  ;;  %v287_v35 = vadd.f32 %v413_v17, %v272_v27  ;;  %v288_v36 = vadd.f32 %v413_v17, %v273_v28  ;;  %v289_v37 = vadd.f32 %v413_v17, %v274_v29 }
  0x24   : > { %v290_v38 = vmax.f32 %v282_v30, 0.0  ;;  %v291_v39 = vmax.f32 %v283_v31, 0.0  ;;  %v292_v40 = vmax.f32 %v284_v32, 0.0  ;;  %v293_v41 = vmax.f32 %v285_v33, 0.0  ;;  %s242_s11 = scalar_lea.vmem %s608_s3, %s411_s8 }
  0x25   : > { %v294_v42 = vmax.f32 %v286_v34, 0.0  ;;  %v295_v43 = vmax.f32 %v287_v35, 0.0  ;;  %v296_v44 = vmax.f32 %v288_v36, 0.0  ;;  %v297_v45 = vmax.f32 %v289_v37, 0.0 }
  0x26   : > { %v453_v46 = vpack.c.bf16 %v291_v39, %v290_v38  ;;  %v458_v47 = vpack.c.bf16 %v293_v41, %v292_v40 }
  0x27   : > { %v463_v48 = vpack.c.bf16 %v295_v43, %v294_v42  ;;  %v468_v49 = vpack.c.bf16 %v297_v45, %v296_v44 }
  0x28   : > { %454 = vst [vmem:[%s242_s11] sm:$0xff] %v453_v46   ;;  %473 = vst [vmem:[%s242_s11 + $0x8] sm:$0xff] %v458_v47  }
  0x29   : > { %474 = vst [vmem:[%s242_s11 + $0x10] sm:$0xff] %v463_v48   ;;  %475 = vst [vmem:[%s242_s11 + $0x18] sm:$0xff] %v468_v49  }
  0x2a PF: > { %p10_p9 = scmp.ge.s32.totalorder %s561_s16, 4   ;;  %s609_s12 = smov %s518_s13 }
  0x2b   : > { %s610_s13 = smov %s570_s19  ;;  %s611_s14 = smov %s561_s16 }
  0x2c   :  { %12 = sbr.rel (!%p10_p9) target bundleno = 2 (0x2), region = 108 }

// kernel: res_block_forward.4
= control target key start
LH: loop header
LB: loop body
LE: loop exit
PB: predicated region body
PF: predicated region fallthrough
CT: control target
= control target key end

     0   :  { %s756_s12 = smov 0   ;;  %s849_s0 = inlined_call_operand.vmem [shape: bf16[128,128], index: 0, kind: input, shape index: {}]   ;;  %s850_s1 = inlined_call_operand.vmem [shape: bf16[128,256], index: 1, kind: input, shape index: {}]   ;;  %s851_s2 = inlined_call_operand.vmem [shape: bf16[128,256], index: 2, kind: output, shape index: {0}]   ;;  %s852_s3 = inlined_call_operand.vmem [shape: f32[2,2,256], index: 3, kind: output, shape index: {1}]  }
   0x1 LB: > { %s762_s13 = sadd.s32 4294967295, %s733_s12   ;;  %p625_p0 = scmp.ge.s32.totalorder %s733_s12, 1  ;;  %s733_s12 = sphi %s756_s12, %s14_s12  }
   0x2   : > { %p141_p1 = scmp.lt.s32.totalorder %s733_s12, 3 }
   0x4   : > { %p142_p2 = pnand %p625_p0, %p141_p1 }
   0x5   : > { %v699_v0 = vld [vmem:[%s850_s1 + $0x4] ss:$8 sps:$4 sm:$0xff] (!%p142_p2)   ;;  %s626_s16 = sshll.u32 (!%p142_p2), %s762_s13, 3  ;;  %v701_v1 = vld [vmem:[%s850_s1] ss:$8 sps:$4 sm:$0xff] (!%p142_p2)   ;;  %v735_v2 = vmov (!%p142_p2), 0  }
   0x6   : > { %145 = sbr.rel (%p142_p2) target bundleno = 290 (0x122), region = 28  ;;  %350 = vmatprep.mubr.bf16.mxu0 (!%p142_p2), %v735_v2  ;;  %p172_p3 = scmp.lt.s32.totalorder (!%p142_p2), %s626_s16, 15  ;;  %370 = vmatprep.mubr.bf16.mxu1 (!%p142_p2), %v735_v2  ;;  %v702_v3 = vld [vmem:[%s850_s1 + $0x14] ss:$8 sps:$4 sm:$0xff] (!%p142_p2)   ;;  %v704_v4 = vld [vmem:[%s850_s1 + $0x10] ss:$8 sps:$4 sm:$0xff] (!%p142_p2)  }
   0x7   : > { %318 = vmatprep.subr.bf16.mxu0 (!%p142_p2), %v699_v0  ;;  %674 = vmatprep.subr.bf16.mxu1 (!%p142_p2), %v699_v0  ;;  %v705_v5 = vld [vmem:[%s850_s1 + $0x24] ss:$8 sps:$4 sm:$0xff] (!%p142_p2)   ;;  %v707_v6 = vld [vmem:[%s850_s1 + $0x20] ss:$8 sps:$4 sm:$0xff] (!%p142_p2)   ;;  %v708_v7 = vld [vmem:[%s850_s1 + $0x34] ss:$8 sps:$4 sm:$0xff] (!%p142_p2)  }
   0x8   : > { %319 = vmatpush1.bf16.msra.mxu0 (!%p142_p2), %v701_v1  ;;  %682 = vmatpush1.bf16.msra.mxu1 (!%p142_p2), %v701_v1  ;;  %v710_v8 = vld [vmem:[%s850_s1 + $0x30] ss:$8 sps:$4 sm:$0xff] (!%p142_p2)   ;;  %v711_v9 = vld [vmem:[%s850_s1 + $0x44] ss:$8 sps:$4 sm:$0xff] (!%p142_p2)   ;;  %v713_v10 = vld [vmem:[%s850_s1 + $0x40] ss:$8 sps:$4 sm:$0xff] (!%p142_p2)  }
   0x9   : > { %320 = vmatprep.subr.bf16.mxu0 (!%p142_p2), %v702_v3  ;;  %675 = vmatprep.subr.bf16.mxu1 (!%p142_p2), %v702_v3  ;;  %v714_v11 = vld [vmem:[%s850_s1 + $0x54] ss:$8 sps:$4 sm:$0xff] (!%p142_p2)   ;;  %v716_v12 = vld [vmem:[%s850_s1 + $0x50] ss:$8 sps:$4 sm:$0xff] (!%p142_p2)   ;;  %v717_v13 = vld [vmem:[%s850_s1 + $0x64] ss:$8 sps:$4 sm:$0xff] (!%p142_p2)  }
   0xa   : > { %v719_v14 = vld [vmem:[%s850_s1 + $0x60] ss:$8 sps:$4 sm:$0xff] (!%p142_p2)   ;;  %v720_v15 = vld [vmem:[%s850_s1 + $0x74] ss:$8 sps:$4 sm:$0xff] (!%p142_p2)   ;;  %v722_v16 = vld [vmem:[%s850_s1 + $0x70] ss:$8 sps:$4 sm:$0xff] (!%p142_p2)  }
   0xb   : > { %p184_p4 = scmp.lt.s32.totalorder (!%p142_p2), %s762_s13, 1  ;;  %vm515_vm0 = vcmask (!%p142_p2), 1040384  }
   0xc   : > { %321 = vmatpush1.bf16.msra.mxu0 (!%p142_p2), %v704_v4  ;;  %683 = vmatpush1.bf16.msra.mxu1 (!%p142_p2), %v704_v4 }
   0xd   : > { %s854_s16 = smov (!%p172_p3, %s626_s16), 15  ;;  %322 = vmatprep.subr.bf16.mxu0 %v705_v5  ;;  %676 = vmatprep.subr.bf16.mxu1 %v705_v5  ;;  %s856_s13 = smov (!%p184_p4, %s762_s13), 1 }
   0xe   : > { %s627_s25 = sshll.u32 %s854_s16, 2  ;;  %s664_s27 = sshll.u32 %s854_s16, 3 }
   0xf   : > { %s794_s5 = scalar_lea.vmem %s849_s0, %s627_s25  ;;  %s831_s30 = scalar_lea.vmem %s851_s2, %s664_s27 }
  0x10   : > { %323 = vmatpush1.bf16.msra.mxu0 %v707_v6  ;;  %684 = vmatpush1.bf16.msra.mxu1 %v707_v6  ;;  %v723_v17 = vld [vmem:[%s794_s5] sm:$0xff]   ;;  %v724_v18 = vld [vmem:[%s794_s5 + $0x10] sm:$0xff]   ;;  %v725_v19 = vld [vmem:[%s794_s5 + $0x8] sm:$0xff]   ;;  %s665_s16 = sshll.u32 %s856_s13, 2 }
  0x11   : > { %324 = vmatprep.subr.bf16.mxu0 %v708_v7  ;;  %677 = vmatprep.subr.bf16.mxu1 %v708_v7  ;;  %v726_v20 = vld [vmem:[%s794_s5 + $0x18] sm:$0xff]   ;;  %s188_s6 = scalar_lea.vmem %s852_s3, %s665_s16 }
  0x14   : > { %325 = vmatpush1.bf16.msra.mxu0 %v710_v8  ;;  %685 = vmatpush1.bf16.msra.mxu1 %v710_v8 }
  0x15   : > { %326 = vmatprep.subr.bf16.mxu0 %v711_v9  ;;  %678 = vmatprep.subr.bf16.mxu1 %v711_v9 }
  0x18   : > { %327 = vmatpush1.bf16.msra.mxu0 %v713_v10  ;;  %686 = vmatpush1.bf16.msra.mxu1 %v713_v10 }
  0x19   : > { %328 = vmatprep.subr.bf16.mxu0 %v714_v11  ;;  %679 = vmatprep.subr.bf16.mxu1 %v714_v11 }
  0x1c   : > { %329 = vmatpush1.bf16.msra.mxu0 %v716_v12  ;;  %687 = vmatpush1.bf16.msra.mxu1 %v716_v12 }
  0x1d   : > { %330 = vmatprep.subr.bf16.mxu0 %v717_v13  ;;  %680 = vmatprep.subr.bf16.mxu1 %v717_v13 }
  0x20   : > { %331 = vmatpush1.bf16.msra.mxu0 %v719_v14  ;;  %688 = vmatpush1.bf16.msra.mxu1 %v719_v14 }
  0x21   : > { %332 = vmatprep.subr.bf16.mxu0 %v720_v15  ;;  %681 = vmatprep.subr.bf16.mxu1 %v720_v15 }
  0x24   : > { %333 = vmatpush1.bf16.msra.mxu0 %v722_v16  ;;  %689 = vmatpush1.bf16.msra.mxu1 %v722_v16 }
  0x27   : > { %351 = vmatmul.mubr.bf16.vlgmr.msra.gmra.mrb[0].mxu0 %v723_v17  ;;  %371 = vmatmul.mubr.bf16.vlgmr.msra.gmra.mrb[0].mxu1 %v724_v18 }
  0x28   : > { %360 = vmatprep.mubr.bf16.mxu0 %v735_v2  ;;  %380 = vmatprep.mubr.bf16.mxu1 %v735_v2 }
  0x2f   : > { %361 = vmatmul.mubr.bf16.gmra.mrb[4].mxu0 %v725_v19  ;;  %381 = vmatmul.mubr.bf16.gmra.mrb[4].mxu1 %v726_v20 }
  0xfa   : > { %v352_v21 = vpop.f32.mrb[0].mxu0  ;;  %v372_v22 = vpop.f32.mrb[0].mxu1 }
  0xfb   : > { %v354_v23 = vpop.f32.mrb[1].mxu0  ;;  %v374_v24 = vpop.f32.mrb[1].mxu1  ;;  %v473_v29 = vmul.f32 %v352_v21, %v352_v21  ;;  %v481_v62 = vmul.f32 %v372_v22, %v372_v22 }
  0xfc   : > { %v666_v25 = vpack.c.bf16 %v354_v23, %v352_v21  ;;  %v356_v26 = vpop.f32.mrb[2].mxu0  ;;  %v670_v27 = vpack.c.bf16 %v374_v24, %v372_v22  ;;  %v376_v28 = vpop.f32.mrb[2].mxu1  ;;  %v474_v30 = vmul.f32 %v354_v23, %v354_v23  ;;  %v482_v2 = vmul.f32 %v374_v24, %v374_v24 }
  0xfd   : > { %v447_v31 = vadd.f32 %v356_v26, %v352_v21  ;;  %v475_v32 = vmul.f32 %v356_v26, %v356_v26  ;;  %v358_v33 = vpop.f32.mrb[3].mxu0  ;;  %v378_v34 = vpop.f32.mrb[3].mxu1  ;;  %v483_v5 = vmul.f32 %v376_v28, %v376_v28 }
  0xfe   : > { %439 = vst [vmem:[%s831_s30] sm:$0xff] %v666_v25  ;;  %v667_v35 = vpack.c.bf16 %v358_v33, %v356_v26  ;;  %v460_v36 = vadd.f32 %v358_v33, %v354_v23  ;;  %v476_v37 = vmul.f32 %v358_v33, %v358_v33  ;;  %443 = vst [vmem:[%s831_s30 + $0x20] sm:$0xff] %v670_v27 }
  0xff   : > { %v671_v38 = vpack.c.bf16 %v378_v34, %v376_v28  ;;  %v489_v39 = vadd.f32 %v475_v32, %v473_v29  ;;  %v484_v9 = vmul.f32 %v378_v34, %v378_v34 }
 0x100   : > { %440 = vst [vmem:[%s831_s30 + $0x8] sm:$0xff] %v667_v35  ;;  %v502_v40 = vadd.f32 %v476_v37, %v474_v30 }
 0x101   : > { %444 = vst [vmem:[%s831_s30 + $0x28] sm:$0xff] %v671_v38 }
 0x102   : > { %v362_v41 = vpop.f32.mrb[4].mxu0  ;;  %v382_v42 = vpop.f32.mrb[4].mxu1 }
 0x103   : > { %v448_v43 = vadd.f32 %v447_v31, %v362_v41  ;;  %v477_v44 = vmul.f32 %v362_v41, %v362_v41  ;;  %v364_v45 = vpop.f32.mrb[5].mxu0  ;;  %v384_v46 = vpop.f32.mrb[5].mxu1  ;;  %v485_v8 = vmul.f32 %v382_v42, %v382_v42 }
 0x104   : > { %v668_v47 = vpack.c.bf16 %v364_v45, %v362_v41  ;;  %v461_v48 = vadd.f32 %v460_v36, %v364_v45  ;;  %v478_v49 = vmul.f32 %v364_v45, %v364_v45  ;;  %v366_v50 = vpop.f32.mrb[6].mxu0  ;;  %v672_v51 = vpack.c.bf16 %v384_v46, %v382_v42  ;;  %v386_v52 = vpop.f32.mrb[6].mxu1 }
 0x105   : > { %v490_v53 = vadd.f32 %v489_v39, %v477_v44  ;;  %v449_v54 = vadd.f32 %v448_v43, %v366_v50  ;;  %v479_v55 = vmul.f32 %v366_v50, %v366_v50  ;;  %v368_v56 = vpop.f32.mrb[7].mxu0  ;;  %v388_v57 = vpop.f32.mrb[7].mxu1  ;;  %v486_v12 = vmul.f32 %v384_v46, %v384_v46 }
 0x106   : > { %441 = vst [vmem:[%s831_s30 + $0x10] sm:$0xff] %v668_v47  ;;  %v503_v58 = vadd.f32 %v502_v40, %v478_v49  ;;  %v669_v59 = vpack.c.bf16 %v368_v56, %v366_v50  ;;  %v462_v60 = vadd.f32 %v461_v48, %v368_v56  ;;  %v480_v61 = vmul.f32 %v368_v56, %v368_v56 }
 0x107   : > { %445 = vst [vmem:[%s831_s30 + $0x30] sm:$0xff] %v672_v51  ;;  %v450_v63 = vadd.f32 %v449_v54, %v372_v22  ;;  %v491_v0 = vadd.f32 %v490_v53, %v479_v55  ;;  %v673_v1 = vpack.c.bf16 %v388_v57, %v386_v52  ;;  %v487_v19 = vmul.f32 %v386_v52, %v386_v52 }
 0x108   : > { %442 = vst [vmem:[%s831_s30 + $0x18] sm:$0xff] %v669_v59  ;;  %v463_v3 = vadd.f32 %v462_v60, %v374_v24  ;;  %v504_v4 = vadd.f32 %v503_v58, %v480_v61  ;;  %v488_v22 = vmul.f32 %v388_v57, %v388_v57 }
 0x109   : > { %v492_v6 = vadd.f32 %v491_v0, %v481_v62  ;;  %v451_v7 = vadd.f32 %v450_v63, %v376_v28  ;;  %446 = vst [vmem:[%s831_s30 + $0x38] sm:$0xff] %v673_v1 }
 0x10a   : > { %v505_v10 = vadd.f32 %v504_v4, %v482_v2  ;;  %v464_v11 = vadd.f32 %v463_v3, %v378_v34 }
 0x10b   : > { %v452_v13 = vadd.f32 %v451_v7, %v382_v42  ;;  %v493_v14 = vadd.f32 %v492_v6, %v483_v5 }
 0x10c   : > { %v465_v15 = vadd.f32 %v464_v11, %v384_v46  ;;  %v506_v16 = vadd.f32 %v505_v10, %v484_v9 }
 0x10d   : > { %v494_v17 = vadd.f32 %v493_v14, %v485_v8  ;;  %v453_v18 = vadd.f32 %v452_v13, %v386_v52 }
 0x10e   : > { %v507_v20 = vadd.f32 %v506_v16, %v486_v12  ;;  %v466_v21 = vadd.f32 %v465_v15, %v388_v57 }
 0x10f   : > { %v454_v23 = vrot.slane %v453_v18, 4  ;;  %v495_v24 = vadd.f32 %v494_v17, %v487_v19 }
 0x110   : > { %v467_v25 = vrot.slane %v466_v21, 4  ;;  %v508_v26 = vadd.f32 %v507_v20, %v488_v22 }
 0x111   : > { %v455_v27 = vadd.f32 %v454_v23, %v453_v18  ;;  %v496_v28 = vrot.slane %v495_v24, 4 }
 0x112   : > { %v468_v29 = vadd.f32 %v467_v25, %v466_v21  ;;  %v509_v30 = vrot.slane %v508_v26, 4 }
 0x113   : > { %v456_v31 = vrot.slane %v455_v27, 2  ;;  %v497_v32 = vadd.f32 %v496_v28, %v495_v24 }
 0x114   : > { %v469_v33 = vrot.slane %v468_v29, 2  ;;  %v510_v34 = vadd.f32 %v509_v30, %v508_v26 }
 0x115   : > { %v457_v35 = vadd.f32 %v456_v31, %v455_v27  ;;  %v498_v36 = vrot.slane %v497_v32, 2 }
 0x116   : > { %v470_v37 = vadd.f32 %v469_v33, %v468_v29  ;;  %v511_v38 = vrot.slane %v510_v34, 2 }
 0x117   : > { %v458_v39 = vrot.slane %v457_v35, 1  ;;  %v499_v40 = vadd.f32 %v498_v36, %v497_v32 }
 0x118   : > { %v471_v41 = vrot.slane %v470_v37, 1  ;;  %v512_v42 = vadd.f32 %v511_v38, %v510_v34 }
 0x119   : > { %v500_v43 = vrot.slane %v499_v40, 1  ;;  %v459_v45 = vadd.f32 %v458_v39, %v457_v35 }
 0x11a   : > { %v513_v44 = vrot.slane %v512_v42, 1  ;;  %v472_v47 = vadd.f32 %v471_v41, %v470_v37 }
 0x11b   : > { %v501_v46 = vadd.f32 %v500_v43, %v499_v40 }
 0x11c   : > { %v514_v48 = vadd.f32 %v513_v44, %v512_v42 }
 0x11d   : > { %v516_v49 = vsel %vm515_vm0, %v459_v45, %v501_v46 }
 0x11e   : > { %v517_v50 = vsel %vm515_vm0, %v472_v47, %v514_v48 }
 0x11f   : > { %v520_v51 = vcombine.low %v516_v49, %v517_v50 }
 0x121   : > { %661 = vst.sshfl [vmem:[%s188_s6] sm:$0x33 pattern:$0x76325410] %v520_v51 }
 0x122 PF: > { %s14_s12 = sadd.s32 1, %s733_s12  }
 0x123   : > { %p11_p5 = scmp.ge.s32.totalorder %s14_s12, 4  }
 0x125   :  { %13 = sbr.rel (!%p11_p5) target bundleno = 1 (0x1), region = 70 }

// kernel: res_block_forward.6
= control target key start
LH: loop header
LB: loop body
LE: loop exit
PB: predicated region body
PF: predicated region fallthrough
CT: control target
= control target key end

     0   :  { %s674_s12 = smov 0   ;;  %s736_s0 = inlined_call_operand.vmem [shape: bf16[128,128], index: 0, kind: input, shape index: {}]   ;;  %s737_s1 = inlined_call_operand.vmem [shape: bf16[128,128], index: 1, kind: input, shape index: {}]   ;;  %s738_s2 = inlined_call_operand.vmem [shape: bf16[128,128], index: 2, kind: output, shape index: {0}]   ;;  %s739_s3 = inlined_call_operand.vmem [shape: f32[2,2,128], index: 3, kind: output, shape index: {1}]  }
   0x1 LB: > { %s680_s13 = sadd.s32 4294967295, %s652_s12   ;;  %p515_p0 = scmp.ge.s32.totalorder %s652_s12, 1  ;;  %s652_s12 = sphi %s674_s12, %s14_s12  }
   0x2   : > { %p141_p1 = scmp.lt.s32.totalorder %s652_s12, 3 }
   0x4   : > { %p142_p2 = pnand %p515_p0, %p141_p1 }
   0x5   : > { %v634_v0 = vld [vmem:[%s737_s1] sm:$0xff] (!%p142_p2)   ;;  %s516_s16 = sshll.u32 (!%p142_p2), %s680_s13, 3  ;;  %v635_v1 = vld [vmem:[%s737_s1 + $0x8] sm:$0xff] (!%p142_p2)   ;;  %v636_v2 = vld [vmem:[%s737_s1 + $0x10] sm:$0xff] (!%p142_p2)   ;;  %p181_p4 = scmp.lt.s32.totalorder (!%p142_p2), %s680_s13, 1  ;;  %vm421_vm0 = vcmask (!%p142_p2), 1040384  }
   0x6   : > { %145 = sbr.rel (%p142_p2) target bundleno = 283 (0x11b), region = 28  ;;  %p170_p3 = scmp.lt.s32.totalorder (!%p142_p2), %s516_s16, 15  ;;  %586 = vmatprep.subr.bf16.mxu0 (!%p142_p2), %v634_v0  ;;  %610 = vmatprep.subr.bf16.mxu1 (!%p142_p2), %v634_v0  ;;  %v637_v3 = vld [vmem:[%s737_s1 + $0x18] sm:$0xff] (!%p142_p2)   ;;  %v638_v6 = vld [vmem:[%s737_s1 + $0x20] sm:$0xff] (!%p142_p2)   ;;  %v639_v7 = vld [vmem:[%s737_s1 + $0x28] sm:$0xff] (!%p142_p2)  }
   0x7   : > { %587 = vmatpush3.bf16.msra.mxu0 (!%p142_p2), %v634_v0  ;;  %618 = vmatpush3.bf16.msra.mxu1 (!%p142_p2), %v634_v0  ;;  %v640_v8 = vld [vmem:[%s737_s1 + $0x30] sm:$0xff] (!%p142_p2)   ;;  %v641_v9 = vld [vmem:[%s737_s1 + $0x38] sm:$0xff] (!%p142_p2)  }
   0x8   : > { %588 = vmatprep.subr.bf16.mxu0 (!%p142_p2), %v635_v1  ;;  %611 = vmatprep.subr.bf16.mxu1 (!%p142_p2), %v635_v1 }
   0xb   : > { %589 = vmatpush3.bf16.msra.mxu0 (!%p142_p2), %v635_v1  ;;  %619 = vmatpush3.bf16.msra.mxu1 (!%p142_p2), %v635_v1 }
   0xc   : > { %590 = vmatprep.subr.bf16.mxu0 (!%p142_p2), %v636_v2  ;;  %612 = vmatprep.subr.bf16.mxu1 (!%p142_p2), %v636_v2 }
   0xd   : > { %s741_s16 = smov (!%p170_p3, %s516_s16), 15  ;;  %s743_s13 = smov (!%p181_p4, %s680_s13), 1 }
   0xe   : > { %s517_s21 = sshll.u32 %s741_s16, 2  ;;  %s520_s11 = sshll.u32 %s743_s13, 1 }
   0xf   : > { %s702_s24 = scalar_lea.vmem %s736_s0, %s517_s21  ;;  %591 = vmatpush3.bf16.msra.mxu0 %v636_v2  ;;  %620 = vmatpush3.bf16.msra.mxu1 %v636_v2  ;;  %s179_s10 = scalar_lea.vmem %s738_s2, %s517_s21 }
  0x10   : > { %v642_v4 = vld [vmem:[%s702_s24] sm:$0xff]   ;;  %v644_v5 = vld [vmem:[%s702_s24 + $0x10] sm:$0xff]   ;;  %592 = vmatprep.subr.bf16.mxu0 %v637_v3  ;;  %613 = vmatprep.subr.bf16.mxu1 %v637_v3  ;;  %v643_v10 = vld [vmem:[%s702_s24 + $0x8] sm:$0xff]   ;;  %s184_s16 = scalar_lea.vmem %s739_s3, %s520_s11 }
  0x11   : > { %602 = vmatprep.mubr.bf16.mxu0 %v642_v4  ;;  %606 = vmatprep.mubr.bf16.mxu1 %v644_v5  ;;  %v645_v11 = vld [vmem:[%s702_s24 + $0x18] sm:$0xff]  }
  0x13   : > { %593 = vmatpush3.bf16.msra.mxu0 %v637_v3  ;;  %621 = vmatpush3.bf16.msra.mxu1 %v637_v3 }
  0x14   : > { %594 = vmatprep.subr.bf16.mxu0 %v638_v6  ;;  %614 = vmatprep.subr.bf16.mxu1 %v638_v6 }
  0x17   : > { %595 = vmatpush3.bf16.msra.mxu0 %v638_v6  ;;  %622 = vmatpush3.bf16.msra.mxu1 %v638_v6 }
  0x18   : > { %596 = vmatprep.subr.bf16.mxu0 %v639_v7  ;;  %615 = vmatprep.subr.bf16.mxu1 %v639_v7 }
  0x1b   : > { %597 = vmatpush3.bf16.msra.mxu0 %v639_v7  ;;  %623 = vmatpush3.bf16.msra.mxu1 %v639_v7 }
  0x1c   : > { %598 = vmatprep.subr.bf16.mxu0 %v640_v8  ;;  %616 = vmatprep.subr.bf16.mxu1 %v640_v8 }
  0x1f   : > { %599 = vmatpush3.bf16.msra.mxu0 %v640_v8  ;;  %624 = vmatpush3.bf16.msra.mxu1 %v640_v8 }
  0x20   : > { %600 = vmatprep.subr.bf16.mxu0 %v641_v9  ;;  %617 = vmatprep.subr.bf16.mxu1 %v641_v9 }
  0x23   : > { %601 = vmatpush3.bf16.msra.mxu0 %v641_v9  ;;  %625 = vmatpush3.bf16.msra.mxu1 %v641_v9 }
  0x26   : > { %603 = vmatmul.mubr.bf16.vlgmr.msra.gmra.mrb[0].mxu0 %v643_v10  ;;  %607 = vmatmul.mubr.bf16.vlgmr.msra.gmra.mrb[0].mxu1 %v645_v11 }
  0xf9   : > { %v604_v12 = vpop.f32.mrb[0].mxu0  ;;  %v608_v13 = vpop.f32.mrb[0].mxu1 }
  0xfa   : > { %v316_v14 = vpop.f32.mrb[1].mxu0  ;;  %v332_v15 = vpop.f32.mrb[1].mxu1  ;;  %v402_v27 = vmul.f32 %v604_v12, %v604_v12  ;;  %v406_v39 = vmul.f32 %v608_v13, %v608_v13 }
  0xfb   : > { %v605_v16 = vpop.f32.mrb[2].mxu0  ;;  %v609_v17 = vpop.f32.mrb[2].mxu1  ;;  %v400_v18 = vmul.f32 %v316_v14, %v316_v14  ;;  %v404_v33 = vmul.f32 %v332_v15, %v332_v15 }
  0xfc   : > { %v559_v19 = vpack.c.bf16 %v605_v16, %v604_v12  ;;  %v319_v20 = vpop.f32.mrb[3].mxu0  ;;  %v569_v21 = vpack.c.bf16 %v609_v17, %v608_v13  ;;  %v335_v22 = vpop.f32.mrb[3].mxu1  ;;  %v403_v30 = vmul.f32 %v605_v16, %v605_v16  ;;  %v407_v42 = vmul.f32 %v609_v17, %v609_v17 }
  0xfd   : > { %v554_v23 = vpack.c.bf16 %v319_v20, %v316_v14  ;;  %v387_v24 = vadd.f32 %v319_v20, %v316_v14  ;;  %v401_v25 = vmul.f32 %v319_v20, %v319_v20  ;;  %v564_v26 = vpack.c.bf16 %v335_v22, %v332_v15 }
  0xfe   : > { %571 = vst [vmem:[%s179_s10 + $0x8] sm:$0xff] %v559_v19   ;;  %573 = vst [vmem:[%s179_s10 + $0x18] sm:$0xff] %v569_v21   ;;  %v405_v38 = vmul.f32 %v335_v22, %v335_v22 }
  0xff   : > { %555 = vst [vmem:[%s179_s10] sm:$0xff] %v554_v23   ;;  %v388_v28 = vadd.f32 %v604_v12, %v387_v24  ;;  %v408_v29 = vadd.f32 %v401_v25, %v400_v18  ;;  %572 = vst [vmem:[%s179_s10 + $0x10] sm:$0xff] %v564_v26  }
 0x101   : > { %v409_v31 = vadd.f32 %v408_v29, %v402_v27  ;;  %v389_v32 = vadd.f32 %v605_v16, %v388_v28 }
 0x103   : > { %v390_v34 = vadd.f32 %v389_v32, %v332_v15  ;;  %v410_v35 = vadd.f32 %v409_v31, %v403_v30 }
 0x105   : > { %v411_v36 = vadd.f32 %v410_v35, %v404_v33  ;;  %v391_v37 = vadd.f32 %v390_v34, %v335_v22 }
 0x107   : > { %v392_v40 = vadd.f32 %v608_v13, %v391_v37  ;;  %v412_v41 = vadd.f32 %v411_v36, %v405_v38 }
 0x109   : > { %v393_v43 = vadd.f32 %v609_v17, %v392_v40  ;;  %v413_v44 = vadd.f32 %v412_v41, %v406_v39 }
 0x10b   : > { %v394_v45 = vrot.slane %v393_v43, 4  ;;  %v414_v46 = vadd.f32 %v413_v44, %v407_v42 }
 0x10d   : > { %v395_v47 = vadd.f32 %v394_v45, %v393_v43  ;;  %v415_v48 = vrot.slane %v414_v46, 4 }
 0x10f   : > { %v396_v49 = vrot.slane %v395_v47, 2  ;;  %v416_v50 = vadd.f32 %v415_v48, %v414_v46 }
 0x111   : > { %v397_v51 = vadd.f32 %v396_v49, %v395_v47  ;;  %v417_v52 = vrot.slane %v416_v50, 2 }
 0x113   : > { %v398_v53 = vrot.slane %v397_v51, 1  ;;  %v418_v54 = vadd.f32 %v417_v52, %v416_v50 }
 0x115   : > { %v419_v55 = vrot.slane %v418_v54, 1  ;;  %v399_v56 = vadd.f32 %v398_v53, %v397_v51 }
 0x117   : > { %v420_v57 = vadd.f32 %v419_v55, %v418_v54 }
 0x119   : > { %v422_v58 = vsel %vm421_vm0, %v399_v56, %v420_v57 }
 0x11a   : > { %423 = vst [vmem:[%s184_s16] sm:$0x3] %v422_v58 }
 0x11b PF: > { %s14_s12 = sadd.s32 1, %s652_s12  }
 0x11c   : > { %p11_p5 = scmp.ge.s32.totalorder %s14_s12, 4  }
 0x11e   :  { %13 = sbr.rel (!%p11_p5) target bundleno = 1 (0x1), region = 70 }

// kernel: res_block_forward.7
= control target key start
LH: loop header
LB: loop body
LE: loop exit
PB: predicated region body
PF: predicated region fallthrough
CT: control target
= control target key end

     0   :  { %s689_s21 = smov 0   ;;  %s691_s22 = smov 0   ;;  %s770_s0 = inlined_call_operand.vmem [shape: bf16[128,128], index: 0, kind: input, shape index: {}]   ;;  %s771_s1 = inlined_call_operand.vmem [shape: f32[1,128], index: 1, kind: input, shape index: {}]   ;;  %s772_s2 = inlined_call_operand.vmem [shape: f32[1,128], index: 2, kind: input, shape index: {}]   ;;  %s773_s3 = inlined_call_operand.vmem [shape: bf16[128,256], index: 3, kind: input, shape index: {}]   ;;  %s774_s4 = inlined_call_operand.vmem [shape: f32[1,128], index: 4, kind: input, shape index: {}]   ;;  %s775_s5 = inlined_call_operand.vmem [shape: f32[1,128], index: 5, kind: input, shape index: {}]   ;;  %s776_s6 = inlined_call_operand.vmem [shape: f32[128,128], index: 6, kind: output, shape index: {}]  }
   0x1   :  { %s693_s23 = smov 0  }
   0x2 LB: > { %s540_s24 = sadd.s32 4294967295, %s652_s23   ;;  %s706_s25 = sadd.s32 1, %s652_s23   ;;  %s652_s23 = sphi %s693_s23, %s779_s23   ;;  %s648_s22 = sphi %s691_s22, %s778_s22   ;;  %s644_s21 = sphi %s689_s21, %s777_s21  }
   0x3   : > { %s88_s26 = ssub.s32 %s652_s23, %s706_s25  ;;  %s91_s27 = sadd.s32 1, %s648_s22 }
   0x4   : > { %p89_p0 = scmp.eq.s32.totalorder %s88_s26, 0  ;;  %p98_p1 = scmp.ne.s32.totalorder %s648_s22, %s644_s21 }
   0x5   : > { %p99_p2 = scmp.eq.s32.totalorder %s652_s23, 0  ;;  %p543_p4 = scmp.ge.s32.totalorder %s652_s23, 2 }
   0x6   : > { %s715_s28 = scalar_select %p89_p0, %s648_s22, %s91_s27  }
   0x7   : > { %p100_p3 = por %p99_p2, %p98_p1  ;;  %204 = sbr.rel (%p543_p4) target bundleno = 23 (0x17), region = 32 }
   0xe   : > { %216 = sbr.rel (!%p100_p3) target bundleno = 23 (0x17), region = 40  ;;  %s218_s29 = sand.u32 (%p100_p3), 1, %s648_s22  }
   0xf   : > { %s567_s30 = sshll.u32 (%p100_p3), %s652_s23, 6  ;;  %s544_s7 = sshll.u32 (%p100_p3), %s218_s29, 5 }
  0x10   : > { %s492_s10 = scalar_lea.vmem (%p100_p3), %s773_s3, %s567_s30  ;;  %s220_s11 = scalar_lea.vmem (%p100_p3), [#allocation2], %s544_s7 }
  0x11   : > { %v547_v0 = vld [vmem:[%s492_s10 + $0x4] sm:$0xf] (%p100_p3)  ;;  %v548_v1 = vld [vmem:[%s492_s10 + $0xc] sm:$0xf] (%p100_p3)  ;;  %v549_v2 = vld [vmem:[%s492_s10 + $0x14] sm:$0xf] (%p100_p3) }
  0x12   : > { %242 = vst [vmem:[%s220_s11] sm:$0xf] (%p100_p3), %v547_v0  ;;  %244 = vst [vmem:[%s220_s11 + $0x4] sm:$0xf] (%p100_p3), %v548_v1  ;;  %v550_v3 = vld [vmem:[%s492_s10 + $0x1c] sm:$0xf] (%p100_p3) }
  0x13   : > { %v551_v4 = vld [vmem:[%s492_s10 + $0x24] sm:$0xf] (%p100_p3)  ;;  %246 = vst [vmem:[%s220_s11 + $0x8] sm:$0xf] (%p100_p3), %v549_v2  ;;  %248 = vst [vmem:[%s220_s11 + $0xc] sm:$0xf] (%p100_p3), %v550_v3 }
  0x14   : > { %250 = vst [vmem:[%s220_s11 + $0x10] sm:$0xf] (%p100_p3), %v551_v4  ;;  %v552_v5 = vld [vmem:[%s492_s10 + $0x2c] sm:$0xf] (%p100_p3)  ;;  %v553_v6 = vld [vmem:[%s492_s10 + $0x34] sm:$0xf] (%p100_p3) }
  0x15   : > { %v554_v7 = vld [vmem:[%s492_s10 + $0x3c] sm:$0xf]  ;;  %252 = vst [vmem:[%s220_s11 + $0x14] sm:$0xf] %v552_v5  ;;  %254 = vst [vmem:[%s220_s11 + $0x18] sm:$0xf] %v553_v6 }
  0x16   : > { %256 = vst [vmem:[%s220_s11 + $0x1c] sm:$0xf] %v554_v7 }
  0x17 PF: > { %p555_p5 = scmp.ge.s32.totalorder %s652_s23, 1  ;;  %p294_p6 = scmp.lt.s32.totalorder %s652_s23, 3 }
  0x19   : > { %p295_p7 = pnand %p555_p5, %p294_p6 }
  0x1a   : > { %s301_s12 = sand.u32 (!%p295_p7), 1, %s644_s21   ;;  %s557_s13 = sshll.u32 (!%p295_p7), %s540_s24, 3  ;;  %v563_v8 = vld [vmem:[%s774_s4] ss:$0 sm:$0xff] (!%p295_p7) }
  0x1b   : > { %298 = sbr.rel (%p295_p7) target bundleno = 52 (0x34), region = 81  ;;  %s556_s14 = sshll.u32 (!%p295_p7), %s301_s12, 5  ;;  %v737_v17 = vld [vmem:[%s775_s5] ss:$0 sm:$0xff] (!%p295_p7) }
  0x1c   : > { %p336_p8 = scmp.lt.s32.totalorder (!%p295_p7), %s557_s13, 15  ;;  %s303_s17 = scalar_lea.vmem (!%p295_p7), [#allocation2], %s556_s14  ;;  %v561_v22 = vld [vmem:[%s771_s1] ss:$0 sm:$0xff] (!%p295_p7) }
  0x1d   : > { %v585_v9 = vld [vmem:[%s303_s17] sm:$0xff] (!%p295_p7)   ;;  %v603_v10 = vld [vmem:[%s303_s17 + $0x8] sm:$0xff] (!%p295_p7)   ;;  %v604_v11 = vld [vmem:[%s303_s17 + $0x10] sm:$0xff] (!%p295_p7)  }
  0x1e   : > { %v586_v12 = vunpack.c.l.bf16 (!%p295_p7), %v585_v9  ;;  %v587_v13 = vunpack.c.h.bf16 (!%p295_p7), %v585_v9  ;;  %v590_v14 = vunpack.c.l.bf16 (!%p295_p7), %v603_v10  ;;  %v591_v15 = vunpack.c.h.bf16 (!%p295_p7), %v603_v10  ;;  %v605_v16 = vld [vmem:[%s303_s17 + $0x18] sm:$0xff] (!%p295_p7)   ;;  %v562_v38 = vld [vmem:[%s772_s2] ss:$0 sm:$0xff] (!%p295_p7) }
  0x1f   : > { %v594_v18 = vunpack.c.l.bf16 (!%p295_p7), %v604_v11  ;;  %v595_v19 = vunpack.c.h.bf16 (!%p295_p7), %v604_v11  ;;  %v598_v20 = vunpack.c.l.bf16 (!%p295_p7), %v605_v16  ;;  %v599_v21 = vunpack.c.h.bf16 (!%p295_p7), %v605_v16 }
  0x20   : > { %v417_v23 = vmul.f32 (!%p295_p7), %v586_v12, %v563_v8  ;;  %v418_v24 = vmul.f32 (!%p295_p7), %v587_v13, %v563_v8  ;;  %v419_v25 = vmul.f32 (!%p295_p7), %v590_v14, %v563_v8  ;;  %v420_v26 = vmul.f32 (!%p295_p7), %v591_v15, %v563_v8 }
  0x21   : > { %v421_v30 = vmul.f32 (!%p295_p7), %v594_v18, %v563_v8  ;;  %v422_v31 = vmul.f32 (!%p295_p7), %v595_v19, %v563_v8  ;;  %v423_v32 = vmul.f32 (!%p295_p7), %v598_v20, %v563_v8  ;;  %v424_v33 = vmul.f32 (!%p295_p7), %v599_v21, %v563_v8 }
  0x22   : > { %s781_s13 = smov (!%p336_p8, %s557_s13), 15  ;;  %v432_v35 = vadd.f32 %v737_v17, %v417_v23  ;;  %v433_v37 = vadd.f32 %v737_v17, %v418_v24  ;;  %v434_v40 = vadd.f32 %v737_v17, %v419_v25  ;;  %v435_v42 = vadd.f32 %v737_v17, %v420_v26 }
  0x23   : > { %s558_s18 = sshll.u32 %s781_s13, 2  ;;  %v436_v47 = vadd.f32 %v737_v17, %v421_v30  ;;  %v437_v51 = vadd.f32 %v737_v17, %v422_v31  ;;  %s560_s7 = sshll.u32 %s781_s13, 3  ;;  %v438_v59 = vadd.f32 %v737_v17, %v423_v32  ;;  %v439_v14 = vadd.f32 %v737_v17, %v424_v33 }
  0x24   : > { %s339_s24 = scalar_lea.vmem %s770_s0, %s558_s18  ;;  %s346_s10 = scalar_lea.vmem %s776_s6, %s560_s7 }
  0x25   : > { %v569_v27 = vld [vmem:[%s339_s24] sm:$0xff]   ;;  %v600_v28 = vld [vmem:[%s339_s24 + $0x8] sm:$0xff]   ;;  %v601_v29 = vld [vmem:[%s339_s24 + $0x10] sm:$0xff]  }
  0x26   : > { %v570_v34 = vunpack.c.l.bf16 %v569_v27  ;;  %v571_v36 = vunpack.c.h.bf16 %v569_v27  ;;  %v574_v39 = vunpack.c.l.bf16 %v600_v28  ;;  %v575_v41 = vunpack.c.h.bf16 %v600_v28  ;;  %v602_v43 = vld [vmem:[%s339_s24 + $0x18] sm:$0xff]  }
  0x27   : > { %v578_v46 = vunpack.c.l.bf16 %v601_v29  ;;  %v579_v50 = vunpack.c.h.bf16 %v601_v29  ;;  %v582_v55 = vunpack.c.l.bf16 %v602_v43  ;;  %v583_v3 = vunpack.c.h.bf16 %v602_v43 }
  0x28   : > { %v371_v44 = vmul.f32 %v570_v34, %v561_v22  ;;  %v372_v45 = vmul.f32 %v571_v36, %v561_v22  ;;  %v373_v48 = vmul.f32 %v574_v39, %v561_v22  ;;  %v374_v49 = vmul.f32 %v575_v41, %v561_v22 }
  0x29   : > { %v375_v54 = vmul.f32 %v578_v46, %v561_v22  ;;  %v376_v58 = vmul.f32 %v579_v50, %v561_v22  ;;  %v377_v63 = vmul.f32 %v582_v55, %v561_v22  ;;  %v378_v11 = vmul.f32 %v583_v3, %v561_v22 }
  0x2a   : > { %v386_v52 = vadd.f32 %v562_v38, %v371_v44  ;;  %v387_v53 = vadd.f32 %v562_v38, %v372_v45  ;;  %v388_v56 = vadd.f32 %v562_v38, %v373_v48  ;;  %v389_v57 = vadd.f32 %v562_v38, %v374_v49 }
  0x2b   : > { %v390_v62 = vadd.f32 %v562_v38, %v375_v54  ;;  %v391_v2 = vadd.f32 %v562_v38, %v376_v58  ;;  %v392_v7 = vadd.f32 %v562_v38, %v377_v63  ;;  %v393_v16 = vadd.f32 %v562_v38, %v378_v11 }
  0x2c   : > { %v440_v60 = vadd.f32 %v432_v35, %v386_v52  ;;  %v441_v61 = vadd.f32 %v433_v37, %v387_v53  ;;  %v442_v0 = vadd.f32 %v434_v40, %v388_v56  ;;  %v443_v1 = vadd.f32 %v435_v42, %v389_v57 }
  0x2d   : > { %v444_v6 = vadd.f32 %v436_v47, %v390_v62  ;;  %v445_v10 = vadd.f32 %v437_v51, %v391_v2  ;;  %v446_v13 = vadd.f32 %v438_v59, %v392_v7  ;;  %v447_v19 = vadd.f32 %v439_v14, %v393_v16 }
  0x2e   : > { %v448_v4 = vmax.f32 %v440_v60, 0.0  ;;  %v449_v5 = vmax.f32 %v441_v61, 0.0  ;;  %v450_v8 = vmax.f32 %v442_v0, 0.0  ;;  %v451_v9 = vmax.f32 %v443_v1, 0.0 }
  0x2f   : > { %v452_v12 = vmax.f32 %v444_v6, 0.0  ;;  %v453_v15 = vmax.f32 %v445_v10, 0.0  ;;  %v454_v18 = vmax.f32 %v446_v13, 0.0  ;;  %v455_v20 = vmax.f32 %v447_v19, 0.0 }
  0x30   : > { %456 = vst [vmem:[%s346_s10] sm:$0xff] %v448_v4  ;;  %457 = vst [vmem:[%s346_s10 + $0x8] sm:$0xff] %v449_v5 }
  0x31   : > { %458 = vst [vmem:[%s346_s10 + $0x10] sm:$0xff] %v450_v8  ;;  %459 = vst [vmem:[%s346_s10 + $0x18] sm:$0xff] %v451_v9 }
  0x32   : > { %460 = vst [vmem:[%s346_s10 + $0x20] sm:$0xff] %v452_v12  ;;  %461 = vst [vmem:[%s346_s10 + $0x28] sm:$0xff] %v453_v15 }
  0x33   : > { %462 = vst [vmem:[%s346_s10 + $0x30] sm:$0xff] %v454_v18  ;;  %463 = vst [vmem:[%s346_s10 + $0x38] sm:$0xff] %v455_v20 }
  0x34 PF: > { %p13_p9 = scmp.ge.s32.totalorder %s706_s25, 4   ;;  %s777_s21 = smov %s648_s22 }
  0x35   : > { %s778_s22 = smov %s715_s28  ;;  %s779_s23 = smov %s706_s25 }
  0x36   :  { %15 = sbr.rel (!%p13_p9) target bundleno = 2 (0x2), region = 123 }

</bundles_post_ra>
